<compile_context>
chip_gen: v7x
topology: tpu7x:2x2x1
jax: 0.10.0
libtpu: 0.0.40
codegen_flags: <defaults>
</compile_context>

<pallas_src>
import jax
import jax.numpy as jnp
from jax.experimental import pallas as pl
from jax.experimental.pallas import tpu as pltpu


def _make_kernel(has_weights: bool):
    """Build a kernel specialized (at trace time) on whether weights are used."""

    def kernel(*refs):
        if has_weights:
            scal_ref, a_ref, b_ref, swi_ref, swj_ref, out_ref = refs
        else:
            scal_ref, a_ref, b_ref, out_ref = refs

        sn2 = scal_ref[0]                      # sigma_n^2 (SMEM scalar)
        TM, TN = out_ref.shape

        # MXU: arg_ij = scale * ||x_i - x_j||^2  (all constants folded into
        # the augmented operands by the wrapper).  arg <= 0 exactly; clamp
        # guards catastrophic cancellation from the matmul trick.
        arg = jnp.dot(a_ref[...], b_ref[...], preferred_element_type=jnp.float32)
        K = jnp.exp(jnp.minimum(arg, 0.0))
        if has_weights:
            K = K * swi_ref[...] * swj_ref[...]

        i = pl.program_id(0)
        j = pl.program_id(1)
        row0 = i * TM
        col0 = j * TN
        if TM == TN:                            # static: cheap scalar gate
            on_diag = i == j
        else:                                   # tile range overlaps diagonal?
            on_diag = jnp.logical_and(row0 < col0 + TN, col0 < row0 + TM)

        @pl.when(jnp.logical_not(on_diag))
        def _():
            out_ref[...] = K.astype(out_ref.dtype)

        @pl.when(on_diag)
        def _():
            # Single int32 temporary: global (r == c)  <=>  (i_loc - j_loc) == col0 - row0
            d = (jax.lax.broadcasted_iota(jnp.int32, (TM, TN), 0)
                 - jax.lax.broadcasted_iota(jnp.int32, (TM, TN), 1))
            diag = jnp.where(d == (col0 - row0), sn2, jnp.float32(0.0))
            out_ref[...] = (K + diag).astype(out_ref.dtype)

    return kernel


def weighted_gp_forward(x, lengthscale, sigma_n, weights=None, *,
                        tm=512, tn=1024, out_dtype=jnp.float32):
    """Pallas implementation of WeightedGP.forward(x, weights=weights)."""
    N, D = x.shape
    x = x.astype(jnp.float32)
    tm = min(tm, N)
    tn = min(tn, N)
    assert N % tm == 0 and N % tn == 0, "N must be divisible by tile sizes"
    # v7x has 2 TensorCores: make sure the leading "parallel" axis has >= 2
    # tiles whenever N allows it so both cores get grid work.
    while N // tm < 2 and tm % 2 == 0 and (tm // 2) % 8 == 0:
        tm //= 2

    ls = jnp.asarray(lengthscale, jnp.float32).reshape(())
    sn = jnp.asarray(sigma_n, jnp.float32).reshape(())
    scale = -0.5 / (ls * ls)                         # negative

    # Fold the RBF constants and squared norms into the matmul operands:
    #   a_aug @ b_aug == scale * squared_distances  (exactly <= 0).
    xsq = jnp.sum(x * x, axis=1, keepdims=True)      # (N, 1)
    ones_col = jnp.ones((N, 1), jnp.float32)
    a_aug = jnp.concatenate([x, ones_col, scale * xsq], axis=1)        # (N, D+2)
    b_aug = jnp.concatenate([(-2.0 * scale) * x.T,                     # (D, N)
                             (scale * xsq).T,                          # (1, N)
                             ones_col.T], axis=0)                      # (D+2, N)

    scal = (sn * sn).reshape(1)                      # sigma_n^2 -> SMEM

    has_weights = weights is not None
    in_specs = [
        pl.BlockSpec(memory_space=pltpu.MemorySpace.SMEM),             # sigma_n^2
        pl.BlockSpec((tm, D + 2), lambda i, j: (i, 0)),                # a rows
        pl.BlockSpec((D + 2, tn), lambda i, j: (0, j)),                # b cols
    ]
    args = [scal, a_aug, b_aug]
    if has_weights:
        sw = jnp.sqrt(weights.astype(jnp.float32))
        in_specs += [pl.BlockSpec((tm, 1), lambda i, j: (i, 0)),       # sqrt(w) rows
                     pl.BlockSpec((1, tn), lambda i, j: (0, j))]       # sqrt(w) cols
        args += [sw.reshape(N, 1), sw.reshape(1, N)]

    grid = (N // tm, N // tn)
    return pl.pallas_call(
        _make_kernel(has_weights),
        out_shape=jax.ShapeDtypeStruct((N, N), out_dtype),
        grid=grid,
        in_specs=in_specs,
        out_specs=pl.BlockSpec((tm, tn), lambda i, j: (i, j)),
        compiler_params=pltpu.CompilerParams(
            dimension_semantics=("parallel", "parallel"),
            vmem_limit_bytes=48 * 1024 * 1024),
    )(*args)


def _reference_forward(x, lengthscale, sigma_n, weights=None):
    """Plain-JAX mirror of the PyTorch forward, for validation."""
    sq = jnp.sum((x[:, None, :] - x[None, :, :]) ** 2, axis=-1)
    K = jnp.exp(-0.5 * sq / (lengthscale ** 2))
    if weights is not None:
        sw = jnp.sqrt(weights)
        K = sw[:, None] * K * sw[None, :]
    return K + (sigma_n ** 2) * jnp.eye(x.shape[0], dtype=x.dtype)


if __name__ == "__main__":
    key = jax.random.PRNGKey(0)
    kx, kw = jax.random.split(key)

    N, D = 128, 8
    x = jax.random.normal(kx, (N, D), dtype=jnp.float32)
    weights = jax.random.uniform(kw, (N,), dtype=jnp.float32, minval=0.1, maxval=2.0)

    # Deterministic parameter init (module __init__: torch.ones(1) for both).
    lengthscale = jnp.float32(1.0)
    sigma_n = jnp.float32(1.0)

    # 1) Weighted, default tiles (diag path; TM != TN after v7x-friendly halving).
    K_w = weighted_gp_forward(x, lengthscale, sigma_n, weights=weights)
    jax.block_until_ready(K_w)
    ref_w = _reference_forward(x, lengthscale, sigma_n, weights=weights)
    assert jnp.allclose(K_w, ref_w, rtol=1e-4, atol=1e-5), "weighted mismatch"

    # 2) Unweighted (specialized kernel variant: no sqrt(w) refs at all).
    K_p = weighted_gp_forward(x, lengthscale, sigma_n, weights=None)
    jax.block_until_ready(K_p)
    ref_p = _reference_forward(x, lengthscale, sigma_n, weights=None)
    assert jnp.allclose(K_p, ref_p, rtol=1e-4, atol=1e-5), "unweighted mismatch"

    # 3) Multi-tile grid with TM != TN (exercises overlap test + off-diag path).
    N2 = 256
    x2 = jax.random.normal(jax.random.PRNGKey(1), (N2, D), dtype=jnp.float32)
    w2 = jax.random.uniform(jax.random.PRNGKey(2), (N2,), dtype=jnp.float32,
                            minval=0.1, maxval=2.0)
    K_t = weighted_gp_forward(x2, lengthscale, sigma_n, weights=w2, tm=64, tn=128)
    jax.block_until_ready(K_t)
    ref_t = _reference_forward(x2, lengthscale, sigma_n, weights=w2)
    assert jnp.allclose(K_t, ref_t, rtol=1e-4, atol=1e-5), "tiled (TM!=TN) mismatch"

    # 4) Square tiles (exercises the program_id(0)==program_id(1) diag gate).
    K_s = weighted_gp_forward(x2, lengthscale, sigma_n, weights=w2, tm=128, tn=128)
    jax.block_until_ready(K_s)
    assert jnp.allclose(K_s, ref_t, rtol=1e-4, atol=1e-5), "tiled (TM==TN) mismatch"

    # 5) Optional bf16 output (v5e/v6e writeback-bound option).
    K_bf = weighted_gp_forward(x, lengthscale, sigma_n, weights=weights,
                               out_dtype=jnp.bfloat16)
    jax.block_until_ready(K_bf)
    assert jnp.allclose(K_bf.astype(jnp.float32), ref_w, rtol=3e-2, atol=3e-2), \
        "bf16 output mismatch"

    print("KERNEL_OK")
</pallas_src>

<mosaic_0001>
module attributes {stable_mosaic.version = 11 : i64} {
  func.func @kernel(%arg0: i32, %arg1: i32, %arg2: memref<1xf32, #tpu.memory_space<smem>>, %arg3: memref<64x10xf32, #tpu.memory_space<vmem>>, %arg4: memref<10x128xf32, #tpu.memory_space<vmem>>, %arg5: memref<64x1xf32, #tpu.memory_space<vmem>>, %arg6: memref<1x128xf32, #tpu.memory_space<vmem>>, %arg7: memref<64x128xf32, #tpu.memory_space<vmem>>) attributes {dimension_semantics = [#tpu.dimension_semantics<parallel>, #tpu.dimension_semantics<parallel>], iteration_bounds = array<i64: 2, 1>, scalar_prefetch = 0 : i64, scratch_operands = 0 : i64, tpu.core_type = #tpu.core_type<tc>, window_params = [{transform_indices = @transform_0, window_bounds = array<i64: 1>}, {transform_indices = @transform_1, window_bounds = array<i64: 64, 10>}, {transform_indices = @transform_2, window_bounds = array<i64: 10, 128>}, {transform_indices = @transform_3, window_bounds = array<i64: 64, 1>}, {transform_indices = @transform_4, window_bounds = array<i64: 1, 128>}, {transform_indices = @transform_5, window_bounds = array<i64: 64, 128>}]} {
    %c0 = arith.constant 0 : index
    %0 = memref.load %arg2[%c0] : memref<1xf32, #tpu.memory_space<smem>>
    %c0_0 = arith.constant 0 : index
    %c0_1 = arith.constant 0 : index
    %1 = vector.load %arg3[%c0_0, %c0_1] : memref<64x10xf32, #tpu.memory_space<vmem>>, vector<64x10xf32>
    %c0_2 = arith.constant 0 : index
    %c0_3 = arith.constant 0 : index
    %2 = vector.load %arg4[%c0_2, %c0_3] : memref<10x128xf32, #tpu.memory_space<vmem>>, vector<10x128xf32>
    %cst = arith.constant dense<0.000000e+00> : vector<64x128xf32>
    %3 = tpu.matmul %1, %2, %cst {dimension_numbers = #tpu.dot_dimension_numbers<[1], [0], [0], [1], [0, 0, 1, 1], [], []>} : vector<64x10xf32>, vector<10x128xf32>, vector<64x128xf32> -> vector<64x128xf32>
    %cst_4 = arith.constant 0.000000e+00 : f32
    %4 = vector.broadcast %cst_4 : f32 to vector<64x128xf32>
    %5 = arith.minimumf %3, %4 : vector<64x128xf32>
    %6 = math.exp %5 : vector<64x128xf32>
    %c0_5 = arith.constant 0 : index
    %c0_6 = arith.constant 0 : index
    %7 = vector.load %arg5[%c0_5, %c0_6] : memref<64x1xf32, #tpu.memory_space<vmem>>, vector<64x1xf32>
    %8 = vector.broadcast %7 : vector<64x1xf32> to vector<64x128xf32>
    %9 = arith.mulf %6, %8 : vector<64x128xf32>
    %c0_7 = arith.constant 0 : index
    %c0_8 = arith.constant 0 : index
    %10 = vector.load %arg6[%c0_7, %c0_8] : memref<1x128xf32, #tpu.memory_space<vmem>>, vector<1x128xf32>
    %11 = vector.broadcast %10 : vector<1x128xf32> to vector<64x128xf32>
    %12 = arith.mulf %9, %11 : vector<64x128xf32>
    %c64_i32 = arith.constant 64 : i32
    %13 = arith.muli %arg0, %c64_i32 : i32
    %c128_i32 = arith.constant 128 : i32
    %14 = arith.muli %arg1, %c128_i32 : i32
    %c128_i32_9 = arith.constant 128 : i32
    %15 = arith.addi %14, %c128_i32_9 : i32
    %16 = arith.cmpi slt, %13, %15 : i32
    %c64_i32_10 = arith.constant 64 : i32
    %17 = arith.addi %13, %c64_i32_10 : i32
    %18 = arith.cmpi slt, %14, %17 : i32
    %19 = arith.andi %16, %18 : i1
    %true = arith.constant true
    %20 = arith.xori %19, %true : i1
    %21 = arith.extui %20 : i1 to i32
    %c0_i32 = arith.constant 0 : i32
    %22 = arith.cmpi ne, %21, %c0_i32 : i32
    scf.if %22 {
      %c0_12 = arith.constant 0 : index
      %c0_13 = arith.constant 0 : index
      %25 = vector.load %arg7[%c0_12, %c0_13] : memref<64x128xf32, #tpu.memory_space<vmem>>, vector<64x128xf32>
      tpu.vector_store %arg7[%c0_12, %c0_13], %12 {strides = array<i32>} : memref<64x128xf32, #tpu.memory_space<vmem>>, vector<64x128xf32>,
    } else {
    }
    %23 = arith.extui %19 : i1 to i32
    %c0_i32_11 = arith.constant 0 : i32
    %24 = arith.cmpi ne, %23, %c0_i32_11 : i32
    scf.if %24 {
      %25 = tpu.iota {dimensions = array<i32: 0>} : vector<64x128xi32>
      %26 = tpu.iota {dimensions = array<i32: 1>} : vector<64x128xi32>
      %27 = arith.subi %25, %26 : vector<64x128xi32>
      %28 = arith.subi %14, %13 : i32
      %29 = vector.broadcast %28 : i32 to vector<64x128xi32>
      %30 = arith.cmpi eq, %27, %29 : vector<64x128xi32>
      %cst_12 = arith.constant 0.000000e+00 : f32
      %31 = vector.broadcast %0 : f32 to vector<64x128xf32>
      %32 = vector.broadcast %cst_12 : f32 to vector<64x128xf32>
      %33 = arith.select %30, %31, %32 : vector<64x128xi1>, vector<64x128xf32>
      %34 = arith.addf %12, %33 : vector<64x128xf32>
      %c0_13 = arith.constant 0 : index
      %c0_14 = arith.constant 0 : index
      %35 = vector.load %arg7[%c0_13, %c0_14] : memref<64x128xf32, #tpu.memory_space<vmem>>, vector<64x128xf32>
      tpu.vector_store %arg7[%c0_13, %c0_14], %34 {strides = array<i32>} : memref<64x128xf32, #tpu.memory_space<vmem>>, vector<64x128xf32>,
    } else {
    }
    return
  }
  func.func @transform_0(%arg0: i32, %arg1: i32) -> i32 {
    %c0_i32 = arith.constant 0 : i32
    %c0_i32_0 = arith.constant 0 : i32
    return %c0_i32 : i32
  }
  func.func @transform_1(%arg0: i32, %arg1: i32) -> (i32, i32) {
    %c0_i32 = arith.constant 0 : i32
    %c0_i32_0 = arith.constant 0 : i32
    return %arg0, %c0_i32 : i32, i32
  }
  func.func @transform_2(%arg0: i32, %arg1: i32) -> (i32, i32) {
    %c0_i32 = arith.constant 0 : i32
    %c0_i32_0 = arith.constant 0 : i32
    return %c0_i32, %arg1 : i32, i32
  }
  func.func @transform_3(%arg0: i32, %arg1: i32) -> (i32, i32) {
    %c0_i32 = arith.constant 0 : i32
    %c0_i32_0 = arith.constant 0 : i32
    return %arg0, %c0_i32 : i32, i32
  }
  func.func @transform_4(%arg0: i32, %arg1: i32) -> (i32, i32) {
    %c0_i32 = arith.constant 0 : i32
    %c0_i32_0 = arith.constant 0 : i32
    return %c0_i32, %arg1 : i32, i32
  }
  func.func @transform_5(%arg0: i32, %arg1: i32) -> (i32, i32) {
    %c0_i32 = arith.constant 0 : i32
    return %arg0, %arg1 : i32, i32
  }
}

</mosaic_0001>

<bundles_post_ra>
// kernel: tpu_custom_call.1
= control target key start
LH: loop header
LB: loop body
LE: loop exit
PB: predicated region body
PF: predicated region fallthrough
CT: control target
= control target key end

     0   :  { %s1199_s0 = inlined_call_operand.<no memory space> [shape: f32[1], index: 0, kind: input, shape index: {}]   ;;  %s1200_s1 = inlined_call_operand.vmem [shape: f32[128,10], index: 1, kind: input, shape index: {}]   ;;  %s1201_s2 = inlined_call_operand.vmem [shape: f32[10,128], index: 2, kind: input, shape index: {}]   ;;  %s1202_s3 = inlined_call_operand.vmem [shape: f32[128,1], index: 3, kind: input, shape index: {}]   ;;  %s1203_s4 = inlined_call_operand.vmem [shape: f32[1,128], index: 4, kind: input, shape index: {}]   ;;  %s1204_s5 = inlined_call_operand.hbm [shape: f32[128,128], index: 5, kind: output, shape index: {}]  }
   0x1   :  { %10 = sst [smem:[#allocation2]] %s1199_s0 }
   0x2   :  { %11 = vsyncpa [#allocation4], 0 }
   0x3   :  { %13 = vsyncpa [#allocation4 + $0x1], 0  ;;  %s994_s20 = smov 0   ;;  %s996_s21 = smov 0  }
   0x4   :  { %s998_s22 = smov 0   ;;  %s1000_s23 = smov 0  }
   0x5   :  { %s1002_s24 = smov 0   ;;  %s1004_s25 = smov 0  }
   0x6 LB: > { %s735_s0 = sadd.s32 4294967295, %s954_s25   ;;  %s736_s26 = sadd.s32 4294967294, %s954_s25   ;;  %s954_s25 = sphi %s1004_s25, %s19_s25   ;;  %s950_s24 = sphi %s1002_s24, %s1212_s24   ;;  %s946_s23 = sphi %s1000_s23, %s1211_s23   ;;  %s942_s22 = sphi %s998_s22, %s1210_s22   ;;  %s938_s21 = sphi %s996_s21, %s1209_s21   ;;  %s934_s20 = sphi %s994_s20, %s1208_s20  }
   0x7   : > { %s31_s27 = sadd.s32 1, %s950_s24  ;;  %s165_s28 = sadd.s32 1, %s942_s22 }
   0x8   : > { %p33_p0 = scmp.ge.s32.totalorder %s31_s27, 2  ;;  %p175_p1 = scmp.ne.s32.totalorder %s942_s22, %s938_s21 }
   0x9   : > { %p176_p2 = scmp.eq.s32.totalorder %s735_s0, 1  ;;  %p181_p3 = scmp.ne.s32.totalorder %s938_s21, %s934_s20 }
   0xa   : > { %s1214_s27 = smov (%p33_p0, %s31_s27), 0  ;;  %p182_p5 = scmp.eq.s32.totalorder %s736_s26, 1 }
   0xb   : > { %p1034_p4 = por %p176_p2, %p175_p1  ;;  %s160_s30 = ssub.s32 %s950_s24, %s1214_s27 }
   0xc   : > { %p741_p6 = scmp.ge.s32.totalorder %s954_s25, 1  ;;  %p163_p7 = scmp.eq.s32.totalorder %s160_s30, 0 }
   0xd   : > { %p1041_p8 = por %p182_p5, %p181_p3  ;;  %p234_p9 = scmp.lt.s32.totalorder %s954_s25, 3 }
   0xe   : > { %s1047_s7 = scalar_select %p163_p7, %s942_s22, %s165_s28  }
   0xf   : > { %p235_p10 = pnand %p741_p6, %p234_p9 }
  0x10   : > { %s271_s8 = sand.u32 (!%p235_p10), 1, %s938_s21   ;;  %s1050_s9 = sld [smem:[#allocation2]] (!%p235_p10)  ;;  %v303_v0 = vld [vmem:[%s1201_s2] sm:$0xff] (!%p235_p10)  ;;  %v304_v1 = vld [vmem:[%s1201_s2 + $0x8] sm:$0x3] (!%p235_p10)  ;;  %vm330_vm0 = vcmask (!%p235_p10), 1041408  }
  0x11   : > { %238 = sbr.rel (%p235_p10) target bundleno = 302 (0x12e), region = 40  ;;  %s1060_s14 = sshll.u32 (!%p235_p10), %s271_s8, 6  ;;  %v791_v2 = vpack.c.bf16 (!%p235_p10), %v304_v1, %v303_v0  ;;  %vm956_vm1 = vmmov (!%p235_p10), 1   ;;  %v957_v3 = vmov (!%p235_p10), 0   ;;  %vm305_vm3 = vcmask (!%p235_p10), 80896  }
  0x12   : > { %s743_s15 = sshll.u32 (!%p235_p10), %s946_s23, 3  ;;  %vm792_vm2 = vmpackc.low (!%p235_p10), %vm330_vm0, %vm956_vm1  ;;  %859 = vset.pattern.permute.xlu1 (!%p235_p10), %v957_v3  ;;  %858 = vset.pattern.permute.xlu0 (!%p235_p10), %v957_v3  ;;  %s1078_s30 = sshll.u32 (!%p235_p10), %s946_s23, 6  ;;  %v756_v50 = vld [vmem:[%s1203_s4] ss:$0 sm:$0xff] (!%p235_p10) }
  0x13   : > { %p275_p11 = scmp.lt.s32.totalorder (!%p235_p10), %s743_s15, 15  ;;  %793 = vmatprep.subr.msk.bf16.mxu0 (!%p235_p10), %vm792_vm2, %v791_v2  ;;  %797 = vmatprep.subr.msk.bf16.mxu1 (!%p235_p10), %vm792_vm2, %v791_v2  ;;  %s538_s10 = sadd.s32 (!%p235_p10), 64, %s1078_s30 }
  0x14   : > { %796 = vmatpush3.bf16.msk.msra.mxu0 (!%p235_p10), %vm792_vm2, %v791_v2  ;;  %798 = vmatpush3.bf16.msk.msra.mxu1 (!%p235_p10), %vm792_vm2, %v791_v2  ;;  %p537_p12 = scmp.lt.s32.totalorder (!%p235_p10), %s1078_s30, 128  ;;  %p758_p13 = scmp.gt.s32.totalorder (!%p235_p10), %s538_s10, 0 }
  0x16   : > { %p1082_p0 = pnand (!%p235_p10), %p758_p13, %p537_p12 }
  0x18   : > { %s1216_s15 = smov (!%p275_p11, %s743_s15), 15 }
  0x19   : > { %s744_s16 = sshll.u32 %s1216_s15, 3  ;;  %s1104_s15 = scalar_lea.vmem [#allocation3], %s1060_s14 }
  0x1a   : > { %s278_s19 = scalar_lea.vmem %s1200_s1, %s744_s16  ;;  %s288_s28 = scalar_lea.vmem %s1202_s3, %s744_s16 }
  0x1b   : > { %v295_v4 = vld [vmem:[%s278_s19] sm:$0xff]  ;;  %v296_v6 = vld [vmem:[%s278_s19 + $0x8] sm:$0xff]  ;;  %v297_v8 = vld [vmem:[%s278_s19 + $0x10] sm:$0xff]  ;;  %s563_s16 = ssub.s32 (!%p1082_p0), 0, %s1078_s30 }
  0x1c   : > { %v299_v5 = vld [vmem:[%s278_s19 + $0x20] sm:$0xff]  ;;  %779 = vmatprep.mubr.msk.f32.mxu0 %vm305_vm3, %v295_v4  ;;  %v300_v7 = vld [vmem:[%s278_s19 + $0x28] sm:$0xff]  ;;  %v301_v9 = vld [vmem:[%s278_s19 + $0x30] sm:$0xff] }
  0x1d   : > { %785 = vmatprep.mubr.msk.f32.mxu1 %vm305_vm3, %v299_v5  ;;  %780 = vmatmul.mubr.msk.f32.vlgmr.msra.gmra.mrb[0].mxu0 %vm305_vm3, %v296_v6  ;;  %v465_v10 = vld [vmem:[%s288_s28 + $0x10] sm:$0xff]  ;;  %v298_v11 = vld [vmem:[%s278_s19 + $0x18] sm:$0xff]  ;;  %v463_v13 = vld [vmem:[%s288_s28] sm:$0xff] }
  0x1e   : > { %786 = vmatmul.mubr.msk.f32.vlgmr.msra.gmra.mrb[0].mxu1 %vm305_vm3, %v300_v7  ;;  %782 = vmatprep.mubr.msk.f32.mxu0 %vm305_vm3, %v297_v8  ;;  %v302_v12 = vld [vmem:[%s278_s19 + $0x38] sm:$0xff]  ;;  %v464_v15 = vld [vmem:[%s288_s28 + $0x8] sm:$0xff]  ;;  %v467_v17 = vld [vmem:[%s288_s28 + $0x20] sm:$0xff] }
  0x1f   : > { %788 = vmatprep.mubr.msk.f32.mxu1 %vm305_vm3, %v301_v9  ;;  %483 = vperm.xlu1 %859, %v465_v10   ;;  %v466_v14 = vld [vmem:[%s288_s28 + $0x18] sm:$0xff]  ;;  %v468_v16 = vld [vmem:[%s288_s28 + $0x28] sm:$0xff]  ;;  %v469_v19 = vld [vmem:[%s288_s28 + $0x30] sm:$0xff] }
  0x20   : > { %473 = vperm.xlu0 %858, %v463_v13   ;;  %v470_v18 = vld [vmem:[%s288_s28 + $0x38] sm:$0xff]  ;;  %v544_v13 = vlaneseq (!%p1082_p0) }
  0x21   : > { %783 = vmatmul.mubr.msk.f32.gmra.mrb[2].mxu0 %vm305_vm3, %v298_v11 }
  0x22   : > { %789 = vmatmul.mubr.msk.f32.gmra.mrb[2].mxu1 %vm305_vm3, %v302_v12 }
  0x23   : > { %488 = vperm.xlu1 %859, %v466_v14   ;;  %v545_v14 = vshrl.u32 (!%p1082_p0), %v544_v13, 7 }
  0x24   : > { %478 = vperm.xlu0 %858, %v464_v15   ;;  %v554_v15 = vand.u32 (!%p1082_p0), 127, %v544_v13 }
  0x27   : > { %498 = vperm.xlu1 %859, %v468_v16   ;;  %v564_v16 = vstv (!%p1082_p0), %s563_s16 }
  0x28   : > { %493 = vperm.xlu0 %858, %v467_v17   ;;  %v573_v17 = vstv (!%p1082_p0), %s1050_s9 }
  0x2b   : > { %508 = vperm.xlu1 %859, %v470_v18   ;;  %v555_v18 = vsub.s32 (!%p1082_p0), %v545_v14, %v554_v15 }
  0x2c   : > { %503 = vperm.xlu0 %858, %v469_v19   ;;  %v546_v19 = vadd.s32 (!%p1082_p0), 8, %v545_v14 }
  0x2d   : > { %vm565_vm4 = vcmp.eq.s32.totalorder (!%p1082_p0), %v555_v18, %v564_v16 }
  0x9e   : > { %v484_v26 = vpop.permute.xlu1 %483 }
  0x9f   : > { %v474_v29 = vpop.permute.xlu0 %473 }
  0xa2   : > { %v489_v44 = vpop.permute.xlu1 %488 }
  0xa3   : > { %v479_v47 = vpop.permute.xlu0 %478 }
  0xa6   : > { %v499_v48 = vpop.permute.xlu1 %498 }
  0xa7   : > { %v494_v53 = vpop.permute.xlu0 %493 }
  0xaa   : > { %v509_v1 = vpop.permute.xlu1 %508 }
  0xab   : > { %v504_v8 = vpop.permute.xlu0 %503 }
  0xf0   : > { %v781_v20 = vpop.f32.mrb[0].mxu0 }
  0xf1   : > { %v787_v21 = vpop.f32.mrb[0].mxu1  ;;  %v440_v22 = vmin.f32 %v781_v20, 0.0  ;;  %v400_v24 = vpop.f32.mrb[1].mxu0  ;;  %v547_v20 = vadd.s32 (!%p1082_p0), 16, %v545_v14 }
  0xf2   : > { %v444_v23 = vmin.f32 %v787_v21, 0.0  ;;  %v420_v25 = vpop.f32.mrb[1].mxu1  ;;  %v439_v27 = vmin.f32 %v400_v24, 0.0  ;;  %v548_v21 = vadd.s32 (!%p1082_p0), 24, %v545_v14  ;;  %v551_v24 = vadd.s32 (!%p1082_p0), 48, %v545_v14 }
  0xf3   : > { %v443_v28 = vmin.f32 %v420_v25, 0.0  ;;  %v449_v30 = vmul.f32 1.442695, %v440_v22  ;;  %v549_v22 = vadd.s32 (!%p1082_p0), 32, %v545_v14  ;;  %v552_v25 = vadd.s32 (!%p1082_p0), 56, %v545_v14 }
  0xf4   : > { %v457_v31 = vmul.f32 1.442695, %v444_v23  ;;  %v447_v32 = vmul.f32 1.442695, %v439_v27  ;;  %v784_v34 = vpop.f32.mrb[2].mxu0  ;;  %v550_v23 = vadd.s32 (!%p1082_p0), 40, %v545_v14  ;;  %v557_v27 = vsub.s32 (!%p1082_p0), %v547_v20, %v554_v15 }
  0xf5   : > { %v455_v33 = vmul.f32 1.442695, %v443_v28  ;;  %v790_v35 = vpop.f32.mrb[2].mxu1  ;;  %860 = vpow2.f32 %v449_v30  ;;  %v442_v36 = vmin.f32 %v784_v34, 0.0  ;;  %v410_v38 = vpop.f32.mrb[3].mxu0  ;;  %v558_v28 = vsub.s32 (!%p1082_p0), %v548_v21, %v554_v15 }
  0xf6   : > { %v446_v37 = vmin.f32 %v790_v35, 0.0  ;;  %v430_v39 = vpop.f32.mrb[3].mxu1  ;;  %862 = vpow2.f32 %v457_v31  ;;  %v441_v40 = vmin.f32 %v410_v38, 0.0  ;;  %v559_v30 = vsub.s32 (!%p1082_p0), %v549_v22, %v554_v15 }
  0xf7   : > { %v445_v41 = vmin.f32 %v430_v39, 0.0  ;;  %864 = vpow2.f32 %v447_v32  ;;  %v453_v42 = vmul.f32 1.442695, %v442_v36  ;;  %v560_v31 = vsub.s32 (!%p1082_p0), %v550_v23, %v554_v15 }
  0xf8   : > { %v461_v43 = vmul.f32 1.442695, %v446_v37  ;;  %866 = vpow2.f32 %v455_v33  ;;  %v451_v45 = vmul.f32 1.442695, %v441_v40  ;;  %v561_v32 = vsub.s32 (!%p1082_p0), %v551_v24, %v554_v15 }
  0xf9   : > { %v459_v46 = vmul.f32 1.442695, %v445_v41  ;;  %868 = vpow2.f32 %v453_v42  ;;  %vm567_vm6 = vcmp.eq.s32.totalorder (!%p1082_p0), %v557_v27, %v564_v16  ;;  %vm568_vm7 = vcmp.eq.s32.totalorder (!%p1082_p0), %v558_v28, %v564_v16 }
  0xfa   : > { %870 = vpow2.f32 %v461_v43  ;;  %v576_v35 = vsel (!%p1082_p0), %vm567_vm6, %v573_v17, 0.0  ;;  %v577_v36 = vsel (!%p1082_p0), %vm568_vm7, %v573_v17, 0.0  ;;  %vm569_vm8 = vcmp.eq.s32.totalorder (!%p1082_p0), %v559_v30, %v564_v16 }
  0xfb   : > { %872 = vpow2.f32 %v451_v45  ;;  %v578_v40 = vsel (!%p1082_p0), %vm569_vm8, %v573_v17, 0.0  ;;  %vm570_vm9 = vcmp.eq.s32.totalorder (!%p1082_p0), %v560_v31, %v564_v16  ;;  %vm571_vm10 = vcmp.eq.s32.totalorder (!%p1082_p0), %v561_v32, %v564_v16 }
  0xfc   : > { %874 = vpow2.f32 %v459_v46  ;;  %v562_v42 = vsub.s32 (!%p1082_p0), %v552_v25, %v554_v15  ;;  %v579_v43 = vsel (!%p1082_p0), %vm570_vm9, %v573_v17, 0.0 }
  0xfe   : > { %vm572_vm11 = vcmp.eq.s32.totalorder (!%p1082_p0), %v562_v42, %v564_v16 }
  0xff   : > { %v861_v49 = vpop.eup %860 }
 0x100   : > { %v863_v51 = vpop.eup %862  ;;  %v512_v52 = vmul.f32 %v861_v49, %v479_v47  ;;  %v581_v47 = vsel (!%p1082_p0), %vm572_vm11, %v573_v17, 0.0 }
 0x101   : > { %v865_v54 = vpop.eup %864  ;;  %v516_v55 = vmul.f32 %v863_v51, %v499_v48 }
 0x102   : > { %v867_v56 = vpop.eup %866  ;;  %v1089_v57 = vmul.f32 %v756_v50, %v512_v52  ;;  %v511_v58 = vmul.f32 %v865_v54, %v474_v29  ;;  %v574_v29 = vsel (!%p1082_p0), %vm565_vm4, %v573_v17, 0.0 }
 0x103   : > { %v869_v59 = vpop.eup %868  ;;  %v1091_v60 = vmul.f32 %v756_v50, %v516_v55  ;;  %v515_v61 = vmul.f32 %v867_v56, %v494_v53  ;;  %543 = sbr.rel (%p1082_p0) target bundleno = 270 (0x10e), region = 44 }
 0x104   : > { %v871_v62 = vpop.eup %870  ;;  %v1093_v63 = vmul.f32 %v756_v50, %v511_v58  ;;  %v514_v0 = vmul.f32 %v869_v59, %v489_v44  ;;  %v580_v44 = vsel (!%p1082_p0), %vm571_vm10, %v573_v17, 0.0 }
 0x105   : > { %v873_v2 = vpop.eup %872  ;;  %v1095_v3 = vmul.f32 %v756_v50, %v515_v61  ;;  %v518_v4 = vmul.f32 %v871_v62, %v509_v1  ;;  %v587_v45 = vadd.f32 (!%p1082_p0), %v579_v43, %v1091_v60 }
 0x106   : > { %v875_v5 = vpop.eup %874  ;;  %v1097_v6 = vmul.f32 %v756_v50, %v514_v0  ;;  %v513_v7 = vmul.f32 %v873_v2, %v484_v26  ;;  %v556_v26 = vsub.s32 (!%p1082_p0), %v546_v19, %v554_v15  ;;  %v582_v33 = vadd.f32 (!%p1082_p0), %v574_v29, %v1093_v63 }
 0x107   : > { %v1099_v9 = vmul.f32 %v756_v50, %v518_v4  ;;  %v517_v10 = vmul.f32 %v875_v5, %v504_v8  ;;  %v586_v41 = vadd.f32 (!%p1082_p0), %v578_v40, %v1095_v3  ;;  %595 = vst [vmem:[%s1104_s15 + $0x28] sm:$0xff] (!%p1082_p0), %v587_v45 }
 0x108   : > { %v528_v11 = vmul.f32 %v756_v50, %v513_v7  ;;  %vm566_vm5 = vcmp.eq.s32.totalorder (!%p1082_p0), %v556_v26, %v564_v16  ;;  %590 = vst [vmem:[%s1104_s15] sm:$0xff] (!%p1082_p0), %v582_v33  ;;  %v585_v39 = vadd.f32 (!%p1082_p0), %v577_v36, %v1097_v6 }
 0x109   : > { %v1101_v12 = vmul.f32 %v756_v50, %v517_v10  ;;  %v575_v34 = vsel (!%p1082_p0), %vm566_vm5, %v573_v17, 0.0  ;;  %594 = vst [vmem:[%s1104_s15 + $0x20] sm:$0xff] (!%p1082_p0), %v586_v41  ;;  %v589_v48 = vadd.f32 (!%p1082_p0), %v581_v47, %v1099_v9 }
 0x10a   : > { %v583_v37 = vadd.f32 %v575_v34, %v1089_v57  ;;  %v584_v38 = vadd.f32 %v576_v35, %v528_v11  ;;  %593 = vst [vmem:[%s1104_s15 + $0x18] sm:$0xff] %v585_v39 }
 0x10b   : > { %v588_v46 = vadd.f32 %v580_v44, %v1101_v12  ;;  %597 = vst [vmem:[%s1104_s15 + $0x38] sm:$0xff] %v589_v48 }
 0x10c   : > { %591 = vst [vmem:[%s1104_s15 + $0x8] sm:$0xff] %v583_v37  ;;  %592 = vst [vmem:[%s1104_s15 + $0x10] sm:$0xff] %v584_v38 }
 0x10d   : > { %596 = vst [vmem:[%s1104_s15 + $0x30] sm:$0xff] %v588_v46 }
 0x10e PF: > { %600 = sbr.rel (!%p1082_p0) target bundleno = 277 (0x115), region = 48  ;;  %601 = vst [vmem:[%s1104_s15] sm:$0xff] (%p1082_p0), %v1093_v63  ;;  %602 = vst [vmem:[%s1104_s15 + $0x8] sm:$0xff] (%p1082_p0), %v1089_v57 }
 0x10f   : > { %603 = vst [vmem:[%s1104_s15 + $0x10] sm:$0xff] (%p1082_p0), %v528_v11  ;;  %604 = vst [vmem:[%s1104_s15 + $0x18] sm:$0xff] (%p1082_p0), %v1097_v6 }
 0x110   : > { %605 = vst [vmem:[%s1104_s15 + $0x20] sm:$0xff] (%p1082_p0), %v1095_v3  ;;  %606 = vst [vmem:[%s1104_s15 + $0x28] sm:$0xff] (%p1082_p0), %v1091_v60 }
 0x111   : > { %607 = vst [vmem:[%s1104_s15 + $0x30] sm:$0xff] (%p1082_p0), %v1101_v12  ;;  %608 = vst [vmem:[%s1104_s15 + $0x38] sm:$0xff] (%p1082_p0), %v1099_v9 }
 0x115 PF: > { %s764_s9 = sshll.u32 %s946_s23, 10  ;;  %s624_s19 = sshll.u32 %s1104_s15, 4  ;;  %s1149_s19 = int_to_ptr.vmem [resolvable:$true] %s624_s19 }
 0x116   : > { %s1146_s18 = scalar_lea.hbm %s1204_s5, %s764_s9  ;;  %s1153_s0 = scalar_lea.sflag [#allocation4], %s271_s8 }
 0x117   : > { %s876_s26 = scalar_lea.vmem %s1149_s19, 1024  ;;  %s958_s23 = smov [#allocation3]  }
 0x118   : > { %p877_p1 = scmp.ne.s32.totalorder %s1149_s19, %s876_s26  ;;  %s880_s28 = sshll.u32 %s958_s23, 4  ;;  %s881_s28 = int_to_ptr.vmem [resolvable:$false] %s880_s28 }
 0x119   : > { %s882_s30 = scalar_lea.vmem %s881_s28, 2048  ;;  %p883_p5 = scmp.lt.s32.totalorder %s1149_s19, %s881_s28 }
 0x11a   : > { %p878_p2 = pnand %p877_p1, %p1034_p4  ;;  %p884_p6 = scmp.lt.s32.totalorder %s882_s30, %s876_s26 }
 0x11c   : > { %p879_p3 = pneg %p878_p2  ;;  %p885_p7 = por %p884_p6, %p883_p5 }
 0x11e   : > { %p886_p9 = pnand %p885_p7, %p879_p3 }
 0x120   : > { %889 = shalt.err (!%p886_p9)
}
 0x121   : > { %s890_s8 = scalar_lea.hbm %s1146_s18, 1024  ;;  %s894_s12 = scalar_lea.hbm %s1204_s5, 2048 }
 0x122   : > { %p891_p10 = scmp.ne.s32.totalorder %s1146_s18, %s890_s8  ;;  %p895_p13 = scmp.lt.u32.totalorder %s1146_s18, %s1204_s5 }
 0x123   : > { %p896_p0 = scmp.lt.u32.totalorder %s894_s12, %s890_s8  ;;  %p898_p2 = scmp.lt.u32.totalorder %s890_s8, %s1146_s18 }
 0x124   : > { %p892_p11 = pnand %p891_p10, %p1034_p4 }
 0x125   : > { %p897_p1 = por %p896_p0, %p895_p13 }
 0x126   : > { %p893_p12 = pneg %p892_p11 }
 0x127   : > { %p899_p3 = por %p898_p2, %p897_p1 }
 0x129   : > { %p900_p5 = pnand %p899_p3, %p893_p12 }
 0x12b   : > { %903 = shalt.err (!%p900_p5)
}
 0x12c   : > { %s959_s16 = smov 128   ;;  %s960_s9 = smov 8  }
 0x12d   : > { %799 = dma.vmem_to_hbm [thread:$0]  (%p1034_p4), %s1149_s19, 1024, %s1146_s18, %s1153_s0, %s959_s16, %s959_s16, %s960_s9  }
 0x12e PF: > { %p805_p6 = scmp.ge.s32.totalorder %s954_s25, 2  ;;  %s639_s14 = sand.u32 1, %s934_s20  }
 0x12f   : > { %s640_s17 = scalar_lea.sflag [#allocation4], %s639_s14 }
 0x130   : > { %p802_p7 = pnand %p805_p6, %p1041_p8 }
 0x132   : > { %929 = dma.done.wait (!%p802_p7), %s640_s17, 1024  }
 0x133   : > { %931 = vsyncadd (!%p802_p7), %s640_s17, 4294966272  ;;  %s19_s25 = sadd.s32 1, %s954_s25   ;;  %s1208_s20 = smov %s938_s21 }
 0x134   : > { %p16_p9 = scmp.ge.s32.totalorder %s19_s25, 4   ;;  %s1209_s21 = smov %s942_s22 }
 0x135   : > { %s1210_s22 = smov %s1047_s7  ;;  %s1211_s23 = smov %s950_s24 }
 0x136   : > { %s1212_s24 = smov %s1214_s27  ;;  %18 = sbr.rel (!%p16_p9) target bundleno = 6 (0x6), region = 92 }
 0x13d   :  { %645 = vsyncpa [#allocation4], 1 }
 0x13e   :  { %647 = vsyncpa [#allocation4 + $0x1], 1 }

</bundles_post_ra>
